<compile_context>
chip_gen: v5e
topology: v5e:2x2
jax: 0.10.0
libtpu: 0.0.40
codegen_flags: <defaults>
</compile_context>

<pallas_src>
import jax
import jax.numpy as jnp
from jax.experimental import pallas as pl
from jax.experimental.pallas import tpu as pltpu


def _round_up(x, m):
    return ((x + m - 1) // m) * m


def _linear_clamped_kernel(x_ref, wt_ref, b_ref, o_ref):
    # x_ref  : (tb, tk)  activation tile (compute dtype, e.g. bf16)
    # wt_ref : (tk, tn)  pre-transposed weight tile (compute dtype)
    # b_ref  : (1, tn)   f32 bias tile (cast/pad hoisted to module init)
    # o_ref  : (tb, tn)  f32 output tile, lane-dense (tn multiple of 128).
    # The output block index ignores k, so o_ref stays resident in VMEM across
    # the K grid axis: accumulate into it directly, no scratch accumulator.
    k = pl.program_id(2)
    partial = jnp.dot(x_ref[...], wt_ref[...], preferred_element_type=jnp.float32)

    @pl.when(k == 0)
    def _():
        o_ref[...] = b_ref[...] + partial  # bias broadcast (1,tn)->(tb,tn)

    @pl.when(k > 0)
    def _():
        o_ref[...] = o_ref[...] + partial


def _linear_pallas(x_p, wt_p, b_p, tb, tn, tk):
    B_p, K_p = x_p.shape
    N_p = wt_p.shape[1]
    grid = (B_p // tb, N_p // tn, K_p // tk)

    x_isz = jnp.dtype(x_p.dtype).itemsize
    w_isz = jnp.dtype(wt_p.dtype).itemsize

    # VMEM budget: double-buffered x/w/bias/out tiles (bias (1,tn) is padded
    # to 8 sublanes) + headroom for Mosaic internal scratch.  Capped so the
    # request stays well inside v7x's 64 MiB physical VMEM.
    per_step = tb * tk * x_isz + tk * tn * w_isz + 8 * tn * 4 + tb * tn * 4
    vmem_limit = int(min(max(2 * per_step + (2 << 20), 8 << 20), 48 << 20))

    cost = pl.CostEstimate(
        flops=2 * B_p * N_p * K_p,
        bytes_accessed=(x_p.size * x_isz + wt_p.size * w_isz
                        + b_p.size * 4 + B_p * N_p * 4),
        transcendentals=0,
    )

    return pl.pallas_call(
        _linear_clamped_kernel,
        out_shape=jax.ShapeDtypeStruct((B_p, N_p), jnp.float32),
        grid_spec=pltpu.PrefetchScalarGridSpec(
            num_scalar_prefetch=0,
            grid=grid,
            in_specs=[
                pl.BlockSpec((tb, tk), lambda i, j, k: (i, k)),  # activations
                pl.BlockSpec((tk, tn), lambda i, j, k: (k, j)),  # weight.T
                pl.BlockSpec((1, tn), lambda i, j, k: (0, j)),   # bias (f32)
            ],
            out_specs=pl.BlockSpec((tb, tn), lambda i, j, k: (i, j)),
        ),
        compiler_params=pltpu.CompilerParams(
            dimension_semantics=("parallel", "parallel", "arbitrary"),
            vmem_limit_bytes=vmem_limit,
        ),
        cost_estimate=cost,
    )(x_p, wt_p, b_p)


class LinearClamped:
    """JAX/Pallas port of the PyTorch LinearClamped module (fixed buffers).

    All one-time layout prep (transpose to (K,N), padding to tile multiples,
    dtype cast) happens here in __init__, so each forward call streams the
    weight from HBM exactly once.
    """

    def __init__(self, in_features, out_features, weights, bias_values=None,
                 bias=True, *, compute_dtype=jnp.bfloat16,
                 tile_b=256, tile_n=512, tile_k=1024):
        self.in_features = in_features
        self.out_features = out_features
        self.compute_dtype = jnp.dtype(compute_dtype)
        self._tile_b = tile_b

        weight = jnp.asarray(weights, dtype=jnp.float32).reshape(
            out_features, in_features)
        if bias and bias_values is not None:
            b = jnp.asarray(bias_values, dtype=jnp.float32).reshape(out_features)
        else:
            b = jnp.zeros((out_features,), dtype=jnp.float32)

        K, N = in_features, out_features
        n128 = _round_up(N, 128)
        tn = min(max(128, _round_up(tile_n, 128)), n128)
        # Keep >= 2 N tiles when N allows so the "parallel" j axis can shard
        # across both TensorCores on v7x even when B collapses to one tile.
        if n128 >= 256:
            tn = min(tn, max(128, (n128 // 2) // 128 * 128))
        tk = min(max(128, _round_up(tile_k, 128)), _round_up(K, 128))

        self._tn, self._tk = tn, tk
        self._N_p = _round_up(N, tn)
        self._K_p = _round_up(K, tk)

        # One-time layout prep (hoisted out of the forward path).
        wt = jnp.transpose(weight)                                   # (K, N)
        wt = jnp.pad(wt, ((0, self._K_p - K), (0, self._N_p - N)))
        self._wt_p = wt.astype(self.compute_dtype)
        self._b_p = jnp.pad(b, (0, self._N_p - N)).reshape(1, self._N_p)
        # TODO(synk): on v5e/v6e an int8-quantized weight path (scale folded
        # into the epilogue) would halve weight HBM traffic again; v7x's MXU
        # drops int support so it would need a separate fp8 path.

    def __call__(self, x):
        x = jnp.asarray(x)
        orig_dtype = x.dtype
        if x.ndim == 1:
            x = x.reshape(1, -1)  # matches the input.view(1, -1) branch
        B, K = x.shape
        assert K == self.in_features, "input feature dim mismatch"

        # bf16 packs 2 rows per sublane -> minimum sublane tile of 16.
        min_b = 16 if self.compute_dtype.itemsize < 4 else 8
        tb = min(max(min_b, _round_up(self._tile_b, min_b)), _round_up(B, min_b))
        B_p = _round_up(B, tb)

        x_c = x.astype(self.compute_dtype)
        if B_p != B or self._K_p != K:
            x_c = jnp.pad(x_c, ((0, B_p - B), (0, self._K_p - K)))

        out_p = _linear_pallas(x_c, self._wt_p, self._b_p, tb, self._tn, self._tk)

        out = out_p[:B, :self.out_features]
        if out.dtype != orig_dtype:
            out = out.astype(orig_dtype)
        return out


if __name__ == "__main__":
    key = jax.random.PRNGKey(0)
    k_x, k_w, k_b, k_v, k_x2, k_w2, k_b2 = jax.random.split(key, 7)

    # --- Small case matching the module's intended use (2-D and 1-D input) ---
    batch, in_features, out_features = 8, 32, 64
    weight = jax.random.normal(k_w, (out_features, in_features), dtype=jnp.float32)
    bias = jax.random.normal(k_b, (out_features,), dtype=jnp.float32)
    x = jax.random.normal(k_x, (batch, in_features), dtype=jnp.float32)
    v = jax.random.normal(k_v, (in_features,), dtype=jnp.float32)

    # f32 exact-parity path.
    layer_f32 = LinearClamped(in_features, out_features, weight, bias,
                              compute_dtype=jnp.float32)
    y = jax.block_until_ready(layer_f32(x))
    yv = jax.block_until_ready(layer_f32(v))
    ref = x @ weight.T + bias
    ref_v = v.reshape(1, -1) @ weight.T + bias
    assert y.shape == (batch, out_features)
    assert yv.shape == (1, out_features)
    assert jnp.allclose(y, ref, atol=1e-5, rtol=1e-5)
    assert jnp.allclose(yv, ref_v, atol=1e-5, rtol=1e-5)

    # Default bf16-weight path (f32 accumulation).  Compare against a
    # bf16-rounded-input reference so the tolerance stays tight.
    layer_bf16 = LinearClamped(in_features, out_features, weight, bias)
    y_bf = jax.block_until_ready(layer_bf16(x))
    x_r = x.astype(jnp.bfloat16).astype(jnp.float32)
    w_r = weight.astype(jnp.bfloat16).astype(jnp.float32)
    ref_bf = jnp.einsum("bk,nk->bn", x_r, w_r,
                        precision=jax.lax.Precision.HIGHEST) + bias
    assert y_bf.shape == (batch, out_features)
    assert y_bf.dtype == jnp.float32
    assert jnp.allclose(y_bf, ref_bf, atol=2e-3, rtol=2e-3)

    # --- Larger, non-divisible case: exercises B/N/K tiling, K-axis
    #     accumulation into the resident output tile, and padding/slicing. ---
    B2, K2, N2 = 48, 200, 300
    w2 = jax.random.normal(k_w2, (N2, K2), dtype=jnp.float32)
    b2 = jax.random.normal(k_b2, (N2,), dtype=jnp.float32)
    x2 = jax.random.normal(k_x2, (B2, K2), dtype=jnp.float32)
    layer2 = LinearClamped(K2, N2, w2, b2, compute_dtype=jnp.float32,
                           tile_b=16, tile_n=128, tile_k=128)
    y2 = jax.block_until_ready(layer2(x2))
    ref2 = x2 @ w2.T + b2
    assert y2.shape == (B2, N2)
    assert jnp.allclose(y2, ref2, atol=1e-4, rtol=1e-4)

    print("KERNEL_OK")
</pallas_src>

<mosaic_0001>
module attributes {stable_mosaic.version = 11 : i64} {
  func.func @_linear_clamped_kernel(%arg0: i32, %arg1: i32, %arg2: i32, %arg3: memref<8x128xf32, #tpu.memory_space<vmem>>, %arg4: memref<128x128xf32, #tpu.memory_space<vmem>>, %arg5: memref<1x128xf32, #tpu.memory_space<vmem>>, %arg6: memref<8x128xf32, #tpu.memory_space<vmem>>) attributes {dimension_semantics = [#tpu.dimension_semantics<parallel>, #tpu.dimension_semantics<parallel>, #tpu.dimension_semantics<arbitrary>], iteration_bounds = array<i64: 1, 1, 1>, scalar_prefetch = 0 : i64, scratch_operands = 0 : i64, tpu.core_type = #tpu.core_type<tc>, window_params = [{transform_indices = @transform_0, window_bounds = array<i64: 8, 128>}, {transform_indices = @transform_1, window_bounds = array<i64: 128, 128>}, {transform_indices = @transform_2, window_bounds = array<i64: 1, 128>}, {transform_indices = @transform_3, window_bounds = array<i64: 8, 128>}]} {
    %c0 = arith.constant 0 : index
    %c0_0 = arith.constant 0 : index
    %0 = vector.load %arg3[%c0, %c0_0] : memref<8x128xf32, #tpu.memory_space<vmem>>, vector<8x128xf32>
    %c0_1 = arith.constant 0 : index
    %c0_2 = arith.constant 0 : index
    %1 = vector.load %arg4[%c0_1, %c0_2] : memref<128x128xf32, #tpu.memory_space<vmem>>, vector<128x128xf32>
    %cst = arith.constant dense<0.000000e+00> : vector<8x128xf32>
    %2 = tpu.matmul %0, %1, %cst {dimension_numbers = #tpu.dot_dimension_numbers<[1], [0], [0], [1], [0, 0, 1, 1], [], []>} : vector<8x128xf32>, vector<128x128xf32>, vector<8x128xf32> -> vector<8x128xf32>
    %c0_i32 = arith.constant 0 : i32
    %3 = arith.cmpi eq, %arg2, %c0_i32 : i32
    %4 = arith.extui %3 : i1 to i32
    %c0_i32_3 = arith.constant 0 : i32
    %5 = arith.cmpi ne, %4, %c0_i32_3 : i32
    scf.if %5 {
      %c0_6 = arith.constant 0 : index
      %c0_7 = arith.constant 0 : index
      %9 = vector.load %arg5[%c0_6, %c0_7] : memref<1x128xf32, #tpu.memory_space<vmem>>, vector<1x128xf32>
      %10 = vector.broadcast %9 : vector<1x128xf32> to vector<8x128xf32>
      %11 = arith.addf %10, %2 : vector<8x128xf32>
      %c0_8 = arith.constant 0 : index
      %c0_9 = arith.constant 0 : index
      %12 = vector.load %arg6[%c0_8, %c0_9] : memref<8x128xf32, #tpu.memory_space<vmem>>, vector<8x128xf32>
      tpu.vector_store %arg6[%c0_8, %c0_9], %11 {strides = array<i32>} : memref<8x128xf32, #tpu.memory_space<vmem>>, vector<8x128xf32>,
    } else {
    }
    %c0_i32_4 = arith.constant 0 : i32
    %6 = arith.cmpi sgt, %arg2, %c0_i32_4 : i32
    %7 = arith.extui %6 : i1 to i32
    %c0_i32_5 = arith.constant 0 : i32
    %8 = arith.cmpi ne, %7, %c0_i32_5 : i32
    scf.if %8 {
      %c0_6 = arith.constant 0 : index
      %c0_7 = arith.constant 0 : index
      %9 = vector.load %arg6[%c0_6, %c0_7] : memref<8x128xf32, #tpu.memory_space<vmem>>, vector<8x128xf32>
      %10 = arith.addf %9, %2 : vector<8x128xf32>
      %c0_8 = arith.constant 0 : index
      %c0_9 = arith.constant 0 : index
      %11 = vector.load %arg6[%c0_8, %c0_9] : memref<8x128xf32, #tpu.memory_space<vmem>>, vector<8x128xf32>
      tpu.vector_store %arg6[%c0_8, %c0_9], %10 {strides = array<i32>} : memref<8x128xf32, #tpu.memory_space<vmem>>, vector<8x128xf32>,
    } else {
    }
    return
  }
  func.func @transform_0(%arg0: i32, %arg1: i32, %arg2: i32) -> (i32, i32) {
    %c0_i32 = arith.constant 0 : i32
    return %arg0, %arg2 : i32, i32
  }
  func.func @transform_1(%arg0: i32, %arg1: i32, %arg2: i32) -> (i32, i32) {
    %c0_i32 = arith.constant 0 : i32
    return %arg2, %arg1 : i32, i32
  }
  func.func @transform_2(%arg0: i32, %arg1: i32, %arg2: i32) -> (i32, i32) {
    %c0_i32 = arith.constant 0 : i32
    %c0_i32_0 = arith.constant 0 : i32
    return %c0_i32, %arg1 : i32, i32
  }
  func.func @transform_3(%arg0: i32, %arg1: i32, %arg2: i32) -> (i32, i32) {
    %c0_i32 = arith.constant 0 : i32
    return %arg0, %arg1 : i32, i32
  }
}

</mosaic_0001>

<bundles_post_ra>
// kernel: tpu_custom_call.1
= control target key start
LH: loop header
LB: loop body
LE: loop exit
PB: predicated region body
PF: predicated region fallthrough
CT: control target
= control target key end

     0   :  { %8 = vsyncpa [#allocation3], 0  ;;  %s238_s0 = inlined_call_operand.hbm [shape: f32[8,128], index: 0, kind: input, shape index: {}]   ;;  %s239_s1 = inlined_call_operand.hbm [shape: f32[128,128], index: 1, kind: input, shape index: {}]   ;;  %s240_s2 = inlined_call_operand.vmem [shape: f32[1,128], index: 2, kind: input, shape index: {}]   ;;  %s241_s3 = inlined_call_operand.hbm [shape: f32[8,128], index: 3, kind: output, shape index: {}]  }
   0x1   :  { %9 = vsyncpa [#allocation6], 0 }
   0x2   :  { %10 = vsyncpa [#allocation4], 0  ;;  %s16_s14 = sshll.u32 %s238_s0, 4  ;;  %s201_s15 = smov [#allocation2]   ;;  %s17_s14 = int_to_ptr.hbm [resolvable:$true] %s16_s14 }
   0x3   :  { %s18_s16 = sshll.u32 %s201_s15, 4  ;;  %s26_s19 = sshll.u32 %s239_s1, 4  ;;  %s19_s16 = int_to_ptr.vmem [resolvable:$true] %s18_s16  ;;  %s27_s19 = int_to_ptr.hbm [resolvable:$true] %s26_s19 }
   0x4   :  { %21 = dma.hbm_to_vmem [thread:$0]  %s17_s14, 128, %s19_s16, [#allocation3]  }
   0x5   :  { %s202_s20 = smov [#allocation5]   ;;  %s203_s22 = smov 128  }
   0x6   :  { %s28_s21 = sshll.u32 %s202_s20, 4  ;;  %s204_s23 = smov 8   ;;  %s29_s21 = int_to_ptr.vmem [resolvable:$true] %s28_s21 }
   0x7   :  { %34 = dma.hbm_to_vmem [thread:$0]  %s27_s19, 2048, %s29_s21, [#allocation6], %s203_s22, %s203_s22, %s204_s23  }
   0x8   :  { %195 = dma.done.wait [#allocation3], 128  }
   0x9   :  { %196 = vsyncadd [#allocation3], 4294967168 }
   0xa   :  { %197 = dma.done.wait [#allocation6], 2048  }
   0xb   :  { %198 = vsyncadd [#allocation6], 4294965248  ;;  %v61_v0 = vld [vmem:[#allocation5 + $0x78] sm:$0xff]  ;;  %v60_v1 = vld [vmem:[#allocation5 + $0x70] sm:$0xff]  ;;  %s205_s24 = smov [#allocation7]   ;;  %s106_s28 = sshll.u32 %s241_s3, 4  ;;  %s107_s28 = int_to_ptr.hbm [resolvable:$true] %s106_s28 }
   0xc   :  { %62 = vmatpush.msra.mxu0 %v61_v0  ;;  %v59_v2 = vld [vmem:[#allocation5 + $0x68] sm:$0xff]  ;;  %v58_v3 = vld [vmem:[#allocation5 + $0x60] sm:$0xff]  ;;  %v57_v4 = vld [vmem:[#allocation5 + $0x58] sm:$0xff]  ;;  %s104_s25 = sshll.u32 %s205_s24, 4  ;;  %s105_s25 = int_to_ptr.vmem [resolvable:$true] %s104_s25 }
   0xd   :  { %v56_v5 = vld [vmem:[#allocation5 + $0x50] sm:$0xff]  ;;  %v55_v6 = vld [vmem:[#allocation5 + $0x48] sm:$0xff]  ;;  %v54_v7 = vld [vmem:[#allocation5 + $0x40] sm:$0xff] }
   0xe   :  { %63 = vmatpush.msra.mxu0 %v60_v1  ;;  %v53_v8 = vld [vmem:[#allocation5 + $0x38] sm:$0xff]  ;;  %v52_v9 = vld [vmem:[#allocation5 + $0x30] sm:$0xff]  ;;  %v51_v10 = vld [vmem:[#allocation5 + $0x28] sm:$0xff] }
   0xf   :  { %v50_v11 = vld [vmem:[#allocation5 + $0x20] sm:$0xff]  ;;  %v49_v12 = vld [vmem:[#allocation5 + $0x18] sm:$0xff]  ;;  %v48_v13 = vld [vmem:[#allocation5 + $0x10] sm:$0xff] }
  0x10   :  { %64 = vmatpush.msra.mxu0 %v59_v2  ;;  %v47_v14 = vld [vmem:[#allocation5 + $0x8] sm:$0xff]  ;;  %v46_v15 = vld [vmem:[#allocation5] sm:$0xff]  ;;  %v45_v16 = vld [vmem:[#allocation2] sm:$0xff] }
  0x11   :  { %v122_v17 = vld [vmem:[%s240_s2] ss:$0 sm:$0xff] }
  0x12   :  { %65 = vmatpush.msra.mxu0 %v58_v3 }
  0x14   :  { %66 = vmatpush.msra.mxu0 %v57_v4 }
  0x16   :  { %67 = vmatpush.msra.mxu0 %v56_v5 }
  0x18   :  { %68 = vmatpush.msra.mxu0 %v55_v6 }
  0x1a   :  { %69 = vmatpush.msra.mxu0 %v54_v7 }
  0x1c   :  { %70 = vmatpush.msra.mxu0 %v53_v8 }
  0x1e   :  { %71 = vmatpush.msra.mxu0 %v52_v9 }
  0x20   :  { %72 = vmatpush.msra.mxu0 %v51_v10 }
  0x22   :  { %73 = vmatpush.msra.mxu0 %v50_v11 }
  0x24   :  { %74 = vmatpush.msra.mxu0 %v49_v12 }
  0x26   :  { %75 = vmatpush.msra.mxu0 %v48_v13 }
  0x28   :  { %76 = vmatpush.msra.mxu0 %v47_v14 }
  0x2a   :  { %77 = vmatpush.msra.mxu0 %v46_v15 }
  0x2b   :  { %78 = vmatmul.f32.vlgmr.msra.gmra.mxu0 %v45_v16 }
  0xa8   :  { %v79_v18 = vpop.f32.mrf.mxu0 }
  0xa9   :  { %v90_v19 = vadd.f32 %v122_v17, %v79_v18 }
  0xab   :  { %91 = vst [vmem:[#allocation7] sm:$0xff] %v90_v19 }
  0xac   :  { %109 = dma.vmem_to_hbm [thread:$0]  %s105_s25, 128, %s107_s28, [#allocation4]  }
  0xad   :  { %199 = dma.done.wait [#allocation4], 128  }
  0xae   :  { %200 = vsyncadd [#allocation4], 4294967168 }
  0xaf   :  { %114 = vsyncpa [#allocation3], 1 }
  0xb0   :  { %115 = vsyncpa [#allocation6], 1 }
  0xb1   :  { %116 = vsyncpa [#allocation4], 1 }

</bundles_post_ra>
